<compile_context>
chip_gen: v5e
topology: v5e:2x2
jax: 0.10.0
libtpu: 0.0.40
codegen_flags: <defaults>
</compile_context>

<pallas_src>
import jax
import jax.numpy as jnp
from jax.experimental import pallas as pl
from jax.experimental.pallas import tpu as pltpu

# ---- configuration (small, consistent with the module) ----
D_MODEL = 32
NHEAD = 4
GROUPS = 2
DIM_FF = 4 * D_MODEL   # _ff_block's .view(b, l, 2, d*4//2) requires dim_feedforward == 4*d_model
SEQ = 8
BATCH = 2
EPS = 1e-5


def _layernorm(z, gamma, beta):
    mu = jnp.mean(z, axis=-1, keepdims=True)
    var = jnp.mean((z - mu) ** 2, axis=-1, keepdims=True)
    return (z - mu) * jax.lax.rsqrt(var + EPS) * gamma + beta


def _gelu_exact(x):
    # matches F.gelu default (erf-based, approximate='none')
    return 0.5 * x * (1.0 + jax.lax.erf(x * 0.7071067811865476))


# --------------------------- Pallas kernel ---------------------------
def linearformer_kernel(x_ref, wmat_ref, w2_ref, vecs_ref, o_ref):
    S, D = x_ref.shape          # one batch element: (S, D) = (8, 32)
    H = NHEAD
    dk = D // H

    x = x_ref[...]

    # Static lane slices of the packed buffers (no per-tensor DMA, no in-kernel concat).
    w_qkv = wmat_ref[:, 0:3 * D]          # (D, 3D); 1/sqrt(dk) pre-folded into the Q columns
    w_o   = wmat_ref[:, 3 * D:4 * D]      # (D, D)  block-diag grouped output projection
    w_1   = wmat_ref[:, 4 * D:8 * D]      # (D, 4D) linear1
    b_qkv = vecs_ref[0:1, 0:3 * D]
    b_o   = vecs_ref[1:2, 0:D]
    b_1   = vecs_ref[2:3, 0:4 * D]
    b_2   = vecs_ref[3:4, 0:D]
    g1, be1 = vecs_ref[4:5, 0:D], vecs_ref[5:6, 0:D]
    g2, be2 = vecs_ref[6:7, 0:D], vecs_ref[7:8, 0:D]

    # Fused grouped Q/K/V projection: one full-width MXU matmul.
    qkv = jnp.dot(x, w_qkv, preferred_element_type=jnp.float32) + b_qkv   # (S, 3D)

    # Per-head attention on 2-D lane slices; per-head contexts lane-concat back to (S, D).
    ctx_parts = []
    for h in range(H):
        qh = qkv[:, h * dk:(h + 1) * dk]                     # (S, dk), already scaled
        kh = qkv[:, D + h * dk:D + (h + 1) * dk]             # (S, dk)
        vh = qkv[:, 2 * D + h * dk:2 * D + (h + 1) * dk]     # (S, dk)
        s = jnp.dot(qh, kh.T, preferred_element_type=jnp.float32)   # (S, S)
        s = s - jnp.max(s, axis=-1, keepdims=True)
        e = jnp.exp(s)
        den = jnp.sum(e, axis=-1, keepdims=True)
        r = pl.reciprocal(den, approx=True)
        r = r * (2.0 - den * r)              # one Newton step -> ~f32-exact softmax
        ctx_parts.append(jnp.dot(e * r, vh, preferred_element_type=jnp.float32))
    ctx = jnp.concatenate(ctx_parts, axis=-1)                # (S, D)

    # Grouped output projection (block-diag) in one matmul, residual + LayerNorm 1.
    attn = jnp.dot(ctx, w_o, preferred_element_type=jnp.float32) + b_o
    y = _layernorm(x + attn, g1, be1)

    # Feed-forward: linear1 -> GELU -> block_diag(linear2) (the "split in 2 -> shared
    # linear2 -> concat" collapses into a single matmul), residual + LayerNorm 2.
    h1 = _gelu_exact(jnp.dot(y, w_1, preferred_element_type=jnp.float32) + b_1)   # (S, 4D)
    ff = jnp.dot(h1, w2_ref[...], preferred_element_type=jnp.float32) + b_2

    o_ref[...] = _layernorm(y + ff, g2, be2).astype(o_ref.dtype)


# --------------------------- wrapper ---------------------------
def linearformer_layer(src, packed):
    """src: (S, B, D) float32, seq-first (PyTorch batch_first=False). Returns (S, B, D)."""
    S, B, D = src.shape
    xb = jnp.transpose(src, (1, 0, 2))    # batch-major (B, S, D); tiny, done once outside
    wmat, w2, vecs = packed["wmat"], packed["w2"], packed["vecs"]

    out = pl.pallas_call(
        linearformer_kernel,
        out_shape=jax.ShapeDtypeStruct((B, S, D), jnp.float32),
        grid_spec=pltpu.PrefetchScalarGridSpec(
            num_scalar_prefetch=0,
            grid=(B,),
            in_specs=[
                pl.BlockSpec((None, S, D), lambda b: (b, 0, 0)),       # one batch per step
                pl.BlockSpec(wmat.shape, lambda b: (0, 0)),            # weights stay resident
                pl.BlockSpec(w2.shape, lambda b: (0, 0)),
                pl.BlockSpec(vecs.shape, lambda b: (0, 0)),
            ],
            out_specs=pl.BlockSpec((None, S, D), lambda b: (b, 0, 0)),
        ),
        compiler_params=pltpu.CompilerParams(
            dimension_semantics=("parallel",)),                        # both TCs on v7x
    )(xb, wmat, w2, vecs)
    return jnp.transpose(out, (1, 0, 2))


# --------------------------- parameter packing (done once, wrapper side) ---------------------------
def _block_diag2(w):
    """block_diag(w, w) for a 2-group shared linear, weights stored as (in, out)."""
    z = jnp.zeros_like(w)
    top = jnp.concatenate([w, z], axis=1)
    bot = jnp.concatenate([z, w], axis=1)
    return jnp.concatenate([top, bot], axis=0)


def _tile_bias(b):  # (1, n) -> (1, 2n)
    return jnp.concatenate([b, b], axis=1)


def pack_params(p):
    """Fold grouped/split structure + softmax scale into 3 contiguous weight buffers."""
    D = D_MODEL
    dk = D // NHEAD
    scale = 1.0 / (dk ** 0.5)

    wq = _block_diag2(p["wq"]) * scale     # softmax 1/sqrt(dk) folded into Q
    wk = _block_diag2(p["wk"])
    wv = _block_diag2(p["wv"])
    wo = _block_diag2(p["wo"])
    bq = _tile_bias(p["bq"]) * scale
    bk = _tile_bias(p["bk"])
    bv = _tile_bias(p["bv"])
    bo = _tile_bias(p["bo"])
    w2 = _block_diag2(p["w2"])             # (4D, D)
    b2 = _tile_bias(p["b2"])               # (1, D)

    # Buffer 1: (D, 8D) = (32, 256): [ Wq | Wk | Wv | Wo | W1 ] lane-concatenated.
    wmat = jnp.concatenate([wq, wk, wv, wo, p["w1"]], axis=1)

    # Buffer 3: (8, 128): every bias / LayerNorm vector as one sublane row (zero-padded).
    def row(v):
        v = v.reshape(-1)
        return jnp.pad(v, (0, 4 * D - v.shape[0]))
    vecs = jnp.stack([
        row(jnp.concatenate([bq, bk, bv], axis=1)),   # row 0: b_qkv (96, scaled Q part)
        row(bo),                                      # row 1: b_o   (32)
        row(p["b1"]),                                 # row 2: b_1   (128)
        row(b2),                                      # row 3: b_2   (32)
        row(p["g1"]), row(p["be1"]),                  # rows 4-5: LN1 gamma / beta
        row(p["g2"]), row(p["be2"]),                  # rows 6-7: LN2 gamma / beta
    ], axis=0)
    return {"wmat": wmat, "w2": w2, "vecs": vecs}


# --------------------------- parameter init (deterministic, in-script) ---------------------------
def init_params(key):
    D, FF = D_MODEL, DIM_FF
    dg = D // GROUPS
    ks = jax.random.split(key, 10)

    def xavier(k, fan_in, fan_out):
        bound = float(jnp.sqrt(6.0 / (fan_in + fan_out)))
        return jax.random.uniform(k, (fan_in, fan_out), jnp.float32, -bound, bound)

    def torch_linear(kw, kb, fan_in, fan_out):
        bound = float(1.0 / jnp.sqrt(fan_in))
        w = jax.random.uniform(kw, (fan_in, fan_out), jnp.float32, -bound, bound)
        b = jax.random.uniform(kb, (1, fan_out), jnp.float32, -bound, bound)
        return w, b

    p = {}
    p["wq"] = xavier(ks[0], dg, dg); p["bq"] = jnp.zeros((1, dg), jnp.float32)
    p["wk"] = xavier(ks[1], dg, dg); p["bk"] = jnp.zeros((1, dg), jnp.float32)
    p["wv"] = xavier(ks[2], dg, dg); p["bv"] = jnp.zeros((1, dg), jnp.float32)
    p["wo"] = xavier(ks[3], dg, dg); p["bo"] = jnp.zeros((1, dg), jnp.float32)
    p["w1"], p["b1"] = torch_linear(ks[4], ks[5], D, FF)             # Linear(d_model, dim_ff)
    p["w2"], p["b2"] = torch_linear(ks[6], ks[7], FF // 2, D // 2)   # Linear(dim_ff//2, d_model//2)
    p["g1"] = jnp.ones((1, D), jnp.float32);  p["be1"] = jnp.zeros((1, D), jnp.float32)
    p["g2"] = jnp.ones((1, D), jnp.float32);  p["be2"] = jnp.zeros((1, D), jnp.float32)
    return p


# --------------------------- pure-JAX reference (for sanity check) ---------------------------
def reference(src, p):
    S, B, D = src.shape
    dk = D // NHEAD
    x = jnp.transpose(src, (1, 0, 2))                 # (B, S, D)

    def glin(inp, w, b):
        din, dout = w.shape
        g = inp.reshape(B, S, GROUPS, din)
        o = jnp.einsum('bsgi,io->bsgo', g, w) + b[0]
        return o.reshape(B, S, GROUPS * dout)

    q = glin(x, p["wq"], p["bq"]).reshape(B, S, NHEAD, dk).transpose(0, 2, 1, 3)
    k = glin(x, p["wk"], p["bk"]).reshape(B, S, NHEAD, dk).transpose(0, 2, 1, 3)
    v = glin(x, p["wv"], p["bv"]).reshape(B, S, NHEAD, dk).transpose(0, 2, 1, 3)
    att = jnp.einsum('bhqd,bhkd->bhqk', q, k) / jnp.sqrt(jnp.float32(dk))
    att = jax.nn.softmax(att, axis=-1)
    out = jnp.einsum('bhqk,bhkd->bhqd', att, v).transpose(0, 2, 1, 3).reshape(B, S, D)
    out = glin(out, p["wo"], p["bo"])

    y = _layernorm(x + out, p["g1"][0], p["be1"][0])

    h1 = _gelu_exact(jnp.einsum('bsd,df->bsf', y, p["w1"]) + p["b1"][0])
    h1 = h1.reshape(B, S, 2, DIM_FF // 2)
    ff = (jnp.einsum('bsgi,io->bsgo', h1, p["w2"]) + p["b2"][0]).reshape(B, S, D)
    z = _layernorm(y + ff, p["g2"][0], p["be2"][0])
    return jnp.transpose(z, (1, 0, 2))


if __name__ == "__main__":
    key = jax.random.PRNGKey(0)
    kx, kparam = jax.random.split(key)
    src = jax.random.normal(kx, (SEQ, BATCH, D_MODEL), jnp.float32)
    params = init_params(kparam)
    packed = pack_params(params)     # one-time weight folding into 3 contiguous buffers

    out = linearformer_layer(src, packed)
    out = jax.block_until_ready(out)

    ref = reference(src, params)
    assert out.shape == (SEQ, BATCH, D_MODEL), out.shape
    max_err = float(jnp.max(jnp.abs(out - ref)))
    assert jnp.allclose(out, ref, atol=5e-4, rtol=5e-4), f"kernel/reference mismatch: {max_err}"
    print("KERNEL_OK")
</pallas_src>

<mosaic_0001>
module attributes {stable_mosaic.version = 11 : i64} {
  func.func @linearformer_kernel(%arg0: i32, %arg1: memref<1x8x32xf32, #tpu.memory_space<vmem>>, %arg2: memref<32x256xf32, #tpu.memory_space<vmem>>, %arg3: memref<128x32xf32, #tpu.memory_space<vmem>>, %arg4: memref<8x128xf32, #tpu.memory_space<vmem>>, %arg5: memref<1x8x32xf32, #tpu.memory_space<vmem>>) attributes {dimension_semantics = [#tpu.dimension_semantics<parallel>], iteration_bounds = array<i64: 2>, scalar_prefetch = 0 : i64, scratch_operands = 0 : i64, tpu.core_type = #tpu.core_type<tc>, window_params = [{transform_indices = @transform_0, window_bounds = array<i64: 1, 8, 32>}, {pipeline_mode = #tpu.pipeline_mode<synchronous>, transform_indices = @transform_1, window_bounds = array<i64: 32, 256>}, {pipeline_mode = #tpu.pipeline_mode<synchronous>, transform_indices = @transform_2, window_bounds = array<i64: 128, 32>}, {pipeline_mode = #tpu.pipeline_mode<synchronous>, transform_indices = @transform_3, window_bounds = array<i64: 8, 128>}, {transform_indices = @transform_4, window_bounds = array<i64: 1, 8, 32>}]} {
    %c0 = arith.constant 0 : index
    %c0_0 = arith.constant 0 : index
    %c0_1 = arith.constant 0 : index
    %0 = vector.load %arg1[%c0, %c0_0, %c0_1] : memref<1x8x32xf32, #tpu.memory_space<vmem>>, vector<1x8x32xf32>
    %1 = vector.shape_cast %0 : vector<1x8x32xf32> to vector<8x32xf32>
    %c0_2 = arith.constant 0 : index
    %c0_3 = arith.constant 0 : index
    %2 = vector.load %arg2[%c0_2, %c0_3] : memref<32x256xf32, #tpu.memory_space<vmem>>, vector<32x96xf32>
    %c0_4 = arith.constant 0 : index
    %c96 = arith.constant 96 : index
    %3 = vector.load %arg2[%c0_4, %c96] : memref<32x256xf32, #tpu.memory_space<vmem>>, vector<32x32xf32>
    %c0_5 = arith.constant 0 : index
    %c128 = arith.constant 128 : index
    %4 = vector.load %arg2[%c0_5, %c128] : memref<32x256xf32, #tpu.memory_space<vmem>>, vector<32x128xf32>
    %c0_6 = arith.constant 0 : index
    %c0_7 = arith.constant 0 : index
    %5 = vector.load %arg4[%c0_6, %c0_7] : memref<8x128xf32, #tpu.memory_space<vmem>>, vector<1x96xf32>
    %c1 = arith.constant 1 : index
    %c0_8 = arith.constant 0 : index
    %6 = vector.load %arg4[%c1, %c0_8] : memref<8x128xf32, #tpu.memory_space<vmem>>, vector<1x32xf32>
    %c2 = arith.constant 2 : index
    %c0_9 = arith.constant 0 : index
    %7 = vector.load %arg4[%c2, %c0_9] : memref<8x128xf32, #tpu.memory_space<vmem>>, vector<1x128xf32>
    %c3 = arith.constant 3 : index
    %c0_10 = arith.constant 0 : index
    %8 = vector.load %arg4[%c3, %c0_10] : memref<8x128xf32, #tpu.memory_space<vmem>>, vector<1x32xf32>
    %c4 = arith.constant 4 : index
    %c0_11 = arith.constant 0 : index
    %9 = vector.load %arg4[%c4, %c0_11] : memref<8x128xf32, #tpu.memory_space<vmem>>, vector<1x32xf32>
    %c5 = arith.constant 5 : index
    %c0_12 = arith.constant 0 : index
    %10 = vector.load %arg4[%c5, %c0_12] : memref<8x128xf32, #tpu.memory_space<vmem>>, vector<1x32xf32>
    %c6 = arith.constant 6 : index
    %c0_13 = arith.constant 0 : index
    %11 = vector.load %arg4[%c6, %c0_13] : memref<8x128xf32, #tpu.memory_space<vmem>>, vector<1x32xf32>
    %c7 = arith.constant 7 : index
    %c0_14 = arith.constant 0 : index
    %12 = vector.load %arg4[%c7, %c0_14] : memref<8x128xf32, #tpu.memory_space<vmem>>, vector<1x32xf32>
    %cst = arith.constant dense<0.000000e+00> : vector<8x96xf32>
    %13 = tpu.matmul %1, %2, %cst {dimension_numbers = #tpu.dot_dimension_numbers<[1], [0], [0], [1], [0, 0, 1, 1], [], []>} : vector<8x32xf32>, vector<32x96xf32>, vector<8x96xf32> -> vector<8x96xf32>
    %14 = vector.broadcast %5 : vector<1x96xf32> to vector<8x96xf32>
    %15 = arith.addf %13, %14 : vector<8x96xf32>
    %16 = vector.extract_strided_slice %15 {offsets = [0, 0], sizes = [8, 8], strides = [1, 1]} : vector<8x96xf32> to vector<8x8xf32>
    %17 = vector.extract_strided_slice %15 {offsets = [0, 32], sizes = [8, 8], strides = [1, 1]} : vector<8x96xf32> to vector<8x8xf32>
    %18 = vector.extract_strided_slice %15 {offsets = [0, 64], sizes = [8, 8], strides = [1, 1]} : vector<8x96xf32> to vector<8x8xf32>
    %19 = tpu.transpose %17, [1, 0] : vector<8x8xf32> -> vector<8x8xf32>
    %cst_15 = arith.constant dense<0.000000e+00> : vector<8x8xf32>
    %20 = tpu.matmul %16, %19, %cst_15 {dimension_numbers = #tpu.dot_dimension_numbers<[1], [0], [0], [1], [0, 0, 1, 1], [], []>} : vector<8x8xf32>, vector<8x8xf32>, vector<8x8xf32> -> vector<8x8xf32>
    %cst_16 = arith.constant dense<0xFF800000> : vector<8xf32>
    %21 = vector.multi_reduction <maximumf>, %20, %cst_16 [1] : vector<8x8xf32> to vector<8xf32>
    %22 = vector.shape_cast %21 : vector<8xf32> to vector<8x1xf32>
    %23 = vector.broadcast %22 : vector<8x1xf32> to vector<8x8xf32>
    %24 = arith.subf %20, %23 : vector<8x8xf32>
    %25 = math.exp %24 : vector<8x8xf32>
    %cst_17 = arith.constant dense<0.000000e+00> : vector<8xf32>
    %26 = vector.multi_reduction <add>, %25, %cst_17 [1] : vector<8x8xf32> to vector<8xf32>
    %27 = vector.shape_cast %26 : vector<8xf32> to vector<8x1xf32>
    %28 = tpu.reciprocal %27 {approx = true} : vector<8x1xf32> -> vector<8x1xf32>
    %29 = arith.mulf %27, %28 : vector<8x1xf32>
    %cst_18 = arith.constant 2.000000e+00 : f32
    %30 = vector.broadcast %cst_18 : f32 to vector<8x1xf32>
    %31 = arith.subf %30, %29 : vector<8x1xf32>
    %32 = arith.mulf %28, %31 : vector<8x1xf32>
    %33 = vector.broadcast %32 : vector<8x1xf32> to vector<8x8xf32>
    %34 = arith.mulf %25, %33 : vector<8x8xf32>
    %cst_19 = arith.constant dense<0.000000e+00> : vector<8x8xf32>
    %35 = tpu.matmul %34, %18, %cst_19 {dimension_numbers = #tpu.dot_dimension_numbers<[1], [0], [0], [1], [0, 0, 1, 1], [], []>} : vector<8x8xf32>, vector<8x8xf32>, vector<8x8xf32> -> vector<8x8xf32>
    %36 = vector.extract_strided_slice %15 {offsets = [0, 8], sizes = [8, 8], strides = [1, 1]} : vector<8x96xf32> to vector<8x8xf32>
    %37 = vector.extract_strided_slice %15 {offsets = [0, 40], sizes = [8, 8], strides = [1, 1]} : vector<8x96xf32> to vector<8x8xf32>
    %38 = vector.extract_strided_slice %15 {offsets = [0, 72], sizes = [8, 8], strides = [1, 1]} : vector<8x96xf32> to vector<8x8xf32>
    %39 = tpu.transpose %37, [1, 0] : vector<8x8xf32> -> vector<8x8xf32>
    %cst_20 = arith.constant dense<0.000000e+00> : vector<8x8xf32>
    %40 = tpu.matmul %36, %39, %cst_20 {dimension_numbers = #tpu.dot_dimension_numbers<[1], [0], [0], [1], [0, 0, 1, 1], [], []>} : vector<8x8xf32>, vector<8x8xf32>, vector<8x8xf32> -> vector<8x8xf32>
    %cst_21 = arith.constant dense<0xFF800000> : vector<8xf32>
    %41 = vector.multi_reduction <maximumf>, %40, %cst_21 [1] : vector<8x8xf32> to vector<8xf32>
    %42 = vector.shape_cast %41 : vector<8xf32> to vector<8x1xf32>
    %43 = vector.broadcast %42 : vector<8x1xf32> to vector<8x8xf32>
    %44 = arith.subf %40, %43 : vector<8x8xf32>
    %45 = math.exp %44 : vector<8x8xf32>
    %cst_22 = arith.constant dense<0.000000e+00> : vector<8xf32>
    %46 = vector.multi_reduction <add>, %45, %cst_22 [1] : vector<8x8xf32> to vector<8xf32>
    %47 = vector.shape_cast %46 : vector<8xf32> to vector<8x1xf32>
    %48 = tpu.reciprocal %47 {approx = true} : vector<8x1xf32> -> vector<8x1xf32>
    %49 = arith.mulf %47, %48 : vector<8x1xf32>
    %cst_23 = arith.constant 2.000000e+00 : f32
    %50 = vector.broadcast %cst_23 : f32 to vector<8x1xf32>
    %51 = arith.subf %50, %49 : vector<8x1xf32>
    %52 = arith.mulf %48, %51 : vector<8x1xf32>
    %53 = vector.broadcast %52 : vector<8x1xf32> to vector<8x8xf32>
    %54 = arith.mulf %45, %53 : vector<8x8xf32>
    %cst_24 = arith.constant dense<0.000000e+00> : vector<8x8xf32>
    %55 = tpu.matmul %54, %38, %cst_24 {dimension_numbers = #tpu.dot_dimension_numbers<[1], [0], [0], [1], [0, 0, 1, 1], [], []>} : vector<8x8xf32>, vector<8x8xf32>, vector<8x8xf32> -> vector<8x8xf32>
    %56 = vector.extract_strided_slice %15 {offsets = [0, 16], sizes = [8, 8], strides = [1, 1]} : vector<8x96xf32> to vector<8x8xf32>
    %57 = vector.extract_strided_slice %15 {offsets = [0, 48], sizes = [8, 8], strides = [1, 1]} : vector<8x96xf32> to vector<8x8xf32>
    %58 = vector.extract_strided_slice %15 {offsets = [0, 80], sizes = [8, 8], strides = [1, 1]} : vector<8x96xf32> to vector<8x8xf32>
    %59 = tpu.transpose %57, [1, 0] : vector<8x8xf32> -> vector<8x8xf32>
    %cst_25 = arith.constant dense<0.000000e+00> : vector<8x8xf32>
    %60 = tpu.matmul %56, %59, %cst_25 {dimension_numbers = #tpu.dot_dimension_numbers<[1], [0], [0], [1], [0, 0, 1, 1], [], []>} : vector<8x8xf32>, vector<8x8xf32>, vector<8x8xf32> -> vector<8x8xf32>
    %cst_26 = arith.constant dense<0xFF800000> : vector<8xf32>
    %61 = vector.multi_reduction <maximumf>, %60, %cst_26 [1] : vector<8x8xf32> to vector<8xf32>
    %62 = vector.shape_cast %61 : vector<8xf32> to vector<8x1xf32>
    %63 = vector.broadcast %62 : vector<8x1xf32> to vector<8x8xf32>
    %64 = arith.subf %60, %63 : vector<8x8xf32>
    %65 = math.exp %64 : vector<8x8xf32>
    %cst_27 = arith.constant dense<0.000000e+00> : vector<8xf32>
    %66 = vector.multi_reduction <add>, %65, %cst_27 [1] : vector<8x8xf32> to vector<8xf32>
    %67 = vector.shape_cast %66 : vector<8xf32> to vector<8x1xf32>
    %68 = tpu.reciprocal %67 {approx = true} : vector<8x1xf32> -> vector<8x1xf32>
    %69 = arith.mulf %67, %68 : vector<8x1xf32>
    %cst_28 = arith.constant 2.000000e+00 : f32
    %70 = vector.broadcast %cst_28 : f32 to vector<8x1xf32>
    %71 = arith.subf %70, %69 : vector<8x1xf32>
    %72 = arith.mulf %68, %71 : vector<8x1xf32>
    %73 = vector.broadcast %72 : vector<8x1xf32> to vector<8x8xf32>
    %74 = arith.mulf %65, %73 : vector<8x8xf32>
    %cst_29 = arith.constant dense<0.000000e+00> : vector<8x8xf32>
    %75 = tpu.matmul %74, %58, %cst_29 {dimension_numbers = #tpu.dot_dimension_numbers<[1], [0], [0], [1], [0, 0, 1, 1], [], []>} : vector<8x8xf32>, vector<8x8xf32>, vector<8x8xf32> -> vector<8x8xf32>
    %76 = vector.extract_strided_slice %15 {offsets = [0, 24], sizes = [8, 8], strides = [1, 1]} : vector<8x96xf32> to vector<8x8xf32>
    %77 = vector.extract_strided_slice %15 {offsets = [0, 56], sizes = [8, 8], strides = [1, 1]} : vector<8x96xf32> to vector<8x8xf32>
    %78 = vector.extract_strided_slice %15 {offsets = [0, 88], sizes = [8, 8], strides = [1, 1]} : vector<8x96xf32> to vector<8x8xf32>
    %79 = tpu.transpose %77, [1, 0] : vector<8x8xf32> -> vector<8x8xf32>
    %cst_30 = arith.constant dense<0.000000e+00> : vector<8x8xf32>
    %80 = tpu.matmul %76, %79, %cst_30 {dimension_numbers = #tpu.dot_dimension_numbers<[1], [0], [0], [1], [0, 0, 1, 1], [], []>} : vector<8x8xf32>, vector<8x8xf32>, vector<8x8xf32> -> vector<8x8xf32>
    %cst_31 = arith.constant dense<0xFF800000> : vector<8xf32>
    %81 = vector.multi_reduction <maximumf>, %80, %cst_31 [1] : vector<8x8xf32> to vector<8xf32>
    %82 = vector.shape_cast %81 : vector<8xf32> to vector<8x1xf32>
    %83 = vector.broadcast %82 : vector<8x1xf32> to vector<8x8xf32>
    %84 = arith.subf %80, %83 : vector<8x8xf32>
    %85 = math.exp %84 : vector<8x8xf32>
    %cst_32 = arith.constant dense<0.000000e+00> : vector<8xf32>
    %86 = vector.multi_reduction <add>, %85, %cst_32 [1] : vector<8x8xf32> to vector<8xf32>
    %87 = vector.shape_cast %86 : vector<8xf32> to vector<8x1xf32>
    %88 = tpu.reciprocal %87 {approx = true} : vector<8x1xf32> -> vector<8x1xf32>
    %89 = arith.mulf %87, %88 : vector<8x1xf32>
    %cst_33 = arith.constant 2.000000e+00 : f32
    %90 = vector.broadcast %cst_33 : f32 to vector<8x1xf32>
    %91 = arith.subf %90, %89 : vector<8x1xf32>
    %92 = arith.mulf %88, %91 : vector<8x1xf32>
    %93 = vector.broadcast %92 : vector<8x1xf32> to vector<8x8xf32>
    %94 = arith.mulf %85, %93 : vector<8x8xf32>
    %cst_34 = arith.constant dense<0.000000e+00> : vector<8x8xf32>
    %95 = tpu.matmul %94, %78, %cst_34 {dimension_numbers = #tpu.dot_dimension_numbers<[1], [0], [0], [1], [0, 0, 1, 1], [], []>} : vector<8x8xf32>, vector<8x8xf32>, vector<8x8xf32> -> vector<8x8xf32>
    %96 = tpu.concatenate %35, %55, %75, %95 in 1 : vector<8x8xf32>, vector<8x8xf32>, vector<8x8xf32>, vector<8x8xf32> -> vector<8x32xf32>
    %cst_35 = arith.constant dense<0.000000e+00> : vector<8x32xf32>
    %97 = tpu.matmul %96, %3, %cst_35 {dimension_numbers = #tpu.dot_dimension_numbers<[1], [0], [0], [1], [0, 0, 1, 1], [], []>} : vector<8x32xf32>, vector<32x32xf32>, vector<8x32xf32> -> vector<8x32xf32>
    %98 = vector.broadcast %6 : vector<1x32xf32> to vector<8x32xf32>
    %99 = arith.addf %97, %98 : vector<8x32xf32>
    %100 = arith.addf %1, %99 : vector<8x32xf32>
    %cst_36 = arith.constant dense<0.000000e+00> : vector<8xf32>
    %101 = vector.multi_reduction <add>, %100, %cst_36 [1] : vector<8x32xf32> to vector<8xf32>
    %102 = vector.shape_cast %101 : vector<8xf32> to vector<8x1xf32>
    %cst_37 = arith.constant 3.200000e+01 : f32
    %103 = vector.broadcast %cst_37 : f32 to vector<8x1xf32>
    %104 = arith.divf %102, %103 : vector<8x1xf32>
    %105 = vector.broadcast %104 : vector<8x1xf32> to vector<8x32xf32>
    %106 = arith.subf %100, %105 : vector<8x32xf32>
    %107 = arith.mulf %106, %106 : vector<8x32xf32>
    %cst_38 = arith.constant dense<0.000000e+00> : vector<8xf32>
    %108 = vector.multi_reduction <add>, %107, %cst_38 [1] : vector<8x32xf32> to vector<8xf32>
    %109 = vector.shape_cast %108 : vector<8xf32> to vector<8x1xf32>
    %cst_39 = arith.constant 3.200000e+01 : f32
    %110 = vector.broadcast %cst_39 : f32 to vector<8x1xf32>
    %111 = arith.divf %109, %110 : vector<8x1xf32>
    %112 = vector.broadcast %104 : vector<8x1xf32> to vector<8x32xf32>
    %113 = arith.subf %100, %112 : vector<8x32xf32>
    %cst_40 = arith.constant 9.99999974E-6 : f32
    %114 = vector.broadcast %cst_40 : f32 to vector<8x1xf32>
    %115 = arith.addf %111, %114 : vector<8x1xf32>
    %116 = math.rsqrt %115 : vector<8x1xf32>
    %117 = vector.broadcast %116 : vector<8x1xf32> to vector<8x32xf32>
    %118 = arith.mulf %113, %117 : vector<8x32xf32>
    %119 = vector.broadcast %9 : vector<1x32xf32> to vector<8x32xf32>
    %120 = arith.mulf %118, %119 : vector<8x32xf32>
    %121 = vector.broadcast %10 : vector<1x32xf32> to vector<8x32xf32>
    %122 = arith.addf %120, %121 : vector<8x32xf32>
    %cst_41 = arith.constant dense<0.000000e+00> : vector<8x128xf32>
    %123 = tpu.matmul %122, %4, %cst_41 {dimension_numbers = #tpu.dot_dimension_numbers<[1], [0], [0], [1], [0, 0, 1, 1], [], []>} : vector<8x32xf32>, vector<32x128xf32>, vector<8x128xf32> -> vector<8x128xf32>
    %124 = vector.broadcast %7 : vector<1x128xf32> to vector<8x128xf32>
    %125 = arith.addf %123, %124 : vector<8x128xf32>
    %cst_42 = arith.constant 5.000000e-01 : f32
    %126 = vector.broadcast %cst_42 : f32 to vector<8x128xf32>
    %127 = arith.mulf %126, %125 : vector<8x128xf32>
    %cst_43 = arith.constant 0.707106769 : f32
    %128 = vector.broadcast %cst_43 : f32 to vector<8x128xf32>
    %129 = arith.mulf %125, %128 : vector<8x128xf32>
    %130 = math.erf %129 : vector<8x128xf32>
    %cst_44 = arith.constant 1.000000e+00 : f32
    %131 = vector.broadcast %cst_44 : f32 to vector<8x128xf32>
    %132 = arith.addf %131, %130 : vector<8x128xf32>
    %133 = arith.mulf %127, %132 : vector<8x128xf32>
    %c0_45 = arith.constant 0 : index
    %c0_46 = arith.constant 0 : index
    %134 = vector.load %arg3[%c0_45, %c0_46] : memref<128x32xf32, #tpu.memory_space<vmem>>, vector<128x32xf32>
    %cst_47 = arith.constant dense<0.000000e+00> : vector<8x32xf32>
    %135 = tpu.matmul %133, %134, %cst_47 {dimension_numbers = #tpu.dot_dimension_numbers<[1], [0], [0], [1], [0, 0, 1, 1], [], []>} : vector<8x128xf32>, vector<128x32xf32>, vector<8x32xf32> -> vector<8x32xf32>
    %136 = vector.broadcast %8 : vector<1x32xf32> to vector<8x32xf32>
    %137 = arith.addf %135, %136 : vector<8x32xf32>
    %138 = arith.addf %122, %137 : vector<8x32xf32>
    %cst_48 = arith.constant dense<0.000000e+00> : vector<8xf32>
    %139 = vector.multi_reduction <add>, %138, %cst_48 [1] : vector<8x32xf32> to vector<8xf32>
    %140 = vector.shape_cast %139 : vector<8xf32> to vector<8x1xf32>
    %cst_49 = arith.constant 3.200000e+01 : f32
    %141 = vector.broadcast %cst_49 : f32 to vector<8x1xf32>
    %142 = arith.divf %140, %141 : vector<8x1xf32>
    %143 = vector.broadcast %142 : vector<8x1xf32> to vector<8x32xf32>
    %144 = arith.subf %138, %143 : vector<8x32xf32>
    %145 = arith.mulf %144, %144 : vector<8x32xf32>
    %cst_50 = arith.constant dense<0.000000e+00> : vector<8xf32>
    %146 = vector.multi_reduction <add>, %145, %cst_50 [1] : vector<8x32xf32> to vector<8xf32>
    %147 = vector.shape_cast %146 : vector<8xf32> to vector<8x1xf32>
    %cst_51 = arith.constant 3.200000e+01 : f32
    %148 = vector.broadcast %cst_51 : f32 to vector<8x1xf32>
    %149 = arith.divf %147, %148 : vector<8x1xf32>
    %150 = vector.broadcast %142 : vector<8x1xf32> to vector<8x32xf32>
    %151 = arith.subf %138, %150 : vector<8x32xf32>
    %cst_52 = arith.constant 9.99999974E-6 : f32
    %152 = vector.broadcast %cst_52 : f32 to vector<8x1xf32>
    %153 = arith.addf %149, %152 : vector<8x1xf32>
    %154 = math.rsqrt %153 : vector<8x1xf32>
    %155 = vector.broadcast %154 : vector<8x1xf32> to vector<8x32xf32>
    %156 = arith.mulf %151, %155 : vector<8x32xf32>
    %157 = vector.broadcast %11 : vector<1x32xf32> to vector<8x32xf32>
    %158 = arith.mulf %156, %157 : vector<8x32xf32>
    %159 = vector.broadcast %12 : vector<1x32xf32> to vector<8x32xf32>
    %160 = arith.addf %158, %159 : vector<8x32xf32>
    %c0_53 = arith.constant 0 : index
    %c0_54 = arith.constant 0 : index
    %c0_55 = arith.constant 0 : index
    %161 = vector.load %arg5[%c0_53, %c0_54, %c0_55] : memref<1x8x32xf32, #tpu.memory_space<vmem>>, vector<1x8x32xf32>
    %162 = vector.shape_cast %161 : vector<1x8x32xf32> to vector<8x32xf32>
    %163 = vector.shape_cast %160 : vector<8x32xf32> to vector<1x8x32xf32>
    tpu.vector_store %arg5[%c0_53, %c0_54, %c0_55], %163 {strides = array<i32>} : memref<1x8x32xf32, #tpu.memory_space<vmem>>, vector<1x8x32xf32>,
    return
  }
  func.func @transform_0(%arg0: i32) -> (i32, i32, i32) {
    %c0_i32 = arith.constant 0 : i32
    %c0_i32_0 = arith.constant 0 : i32
    %c0_i32_1 = arith.constant 0 : i32
    return %arg0, %c0_i32, %c0_i32_0 : i32, i32, i32
  }
  func.func @transform_1(%arg0: i32) -> (i32, i32) {
    %c0_i32 = arith.constant 0 : i32
    %c0_i32_0 = arith.constant 0 : i32
    %c0_i32_1 = arith.constant 0 : i32
    return %c0_i32, %c0_i32_0 : i32, i32
  }
  func.func @transform_2(%arg0: i32) -> (i32, i32) {
    %c0_i32 = arith.constant 0 : i32
    %c0_i32_0 = arith.constant 0 : i32
    %c0_i32_1 = arith.constant 0 : i32
    return %c0_i32, %c0_i32_0 : i32, i32
  }
  func.func @transform_3(%arg0: i32) -> (i32, i32) {
    %c0_i32 = arith.constant 0 : i32
    %c0_i32_0 = arith.constant 0 : i32
    %c0_i32_1 = arith.constant 0 : i32
    return %c0_i32, %c0_i32_0 : i32, i32
  }
  func.func @transform_4(%arg0: i32) -> (i32, i32, i32) {
    %c0_i32 = arith.constant 0 : i32
    %c0_i32_0 = arith.constant 0 : i32
    %c0_i32_1 = arith.constant 0 : i32
    return %arg0, %c0_i32, %c0_i32_0 : i32, i32, i32
  }
}

</mosaic_0001>

<bundles_post_ra>
// kernel: tpu_custom_call.1
= control target key start
LH: loop header
LB: loop body
LE: loop exit
PB: predicated region body
PF: predicated region fallthrough
CT: control target
= control target key end

     0   :  { %9 = vsyncpa [#allocation3], 0  ;;  %s1294_s0 = inlined_call_operand.vmem [shape: f32[2,8,32], index: 0, kind: input, shape index: {}]   ;;  %s1295_s1 = inlined_call_operand.vmem [shape: f32[32,256], index: 1, kind: input, shape index: {}]   ;;  %s1296_s2 = inlined_call_operand.vmem [shape: f32[128,32], index: 2, kind: input, shape index: {}]   ;;  %s1297_s3 = inlined_call_operand.vmem [shape: f32[8,128], index: 3, kind: input, shape index: {}]   ;;  %s1298_s4 = inlined_call_operand.hbm [shape: f32[2,8,32], index: 4, kind: output, shape index: {}]  }
   0x1   :  { %11 = vsyncpa [#allocation3 + $0x1], 0  ;;  %s1034_s15 = smov 0   ;;  %s1036_s16 = smov 0  }
   0x2   :  { %s1038_s17 = smov 0   ;;  %s1040_s18 = smov 0  }
   0x3 LB: > { %s1055_s19 = sadd.s32 4294967295, %s991_s18   ;;  %s806_s20 = sadd.s32 4294967294, %s991_s18   ;;  %s991_s18 = sphi %s1040_s18, %s1304_s18   ;;  %s987_s17 = sphi %s1038_s17, %s1303_s17   ;;  %s983_s16 = sphi %s1036_s16, %s1302_s16   ;;  %s979_s15 = sphi %s1034_s15, %s1301_s15  }
   0x4   : > { %s1059_s21 = sadd.s32 1, %s991_s18   ;;  %s113_s22 = sadd.s32 1, %s987_s17 }
   0x5   : > { %s110_s23 = ssub.s32 %s991_s18, %s1059_s21  ;;  %p123_p0 = scmp.ne.s32.totalorder %s987_s17, %s983_s16 }
   0x6   : > { %p111_p1 = scmp.eq.s32.totalorder %s110_s23, 0  ;;  %p124_p2 = scmp.eq.s32.totalorder %s1055_s19, 1 }
   0x7   : > { %p129_p3 = scmp.ne.s32.totalorder %s983_s16, %s979_s15  ;;  %p130_p4 = scmp.eq.s32.totalorder %s806_s20, 1 }
   0x8   : > { %s1070_s24 = scalar_select %p111_p1, %s987_s17, %s113_s22  }
   0x9   : > { %p1072_p5 = por %p124_p2, %p123_p0  ;;  %p1076_p6 = por %p130_p4, %p129_p3 }
   0xa   : > { %p809_p7 = scmp.ge.s32.totalorder %s991_s18, 1  ;;  %p164_p8 = scmp.lt.s32.totalorder %s991_s18, 3 }
   0xc   : > { %p165_p9 = pnand %p809_p7, %p164_p8 }
   0xd   : > { %p189_p10 = scmp.lt.s32.totalorder (!%p165_p9), %s1055_s19, 1  ;;  %s993_s22 = smov (!%p165_p9), 112  }
   0xe   : > { %168 = sbr.rel (%p165_p9) target bundleno = 1925 (0x785), region = 36  ;;  %s994_s23 = smov (!%p165_p9), 120  }
   0xf   : > { %s995_s27 = smov (!%p165_p9), 96   ;;  %s996_s28 = smov (!%p165_p9), 72  }
  0x10   : > { %s997_s29 = smov (!%p165_p9), 80   ;;  %s998_s30 = smov (!%p165_p9), 88  }
  0x11   : > { %s999_s5 = smov (!%p165_p9), 104   ;;  %s1000_s6 = smov (!%p165_p9), 64  }
  0x12   : > { %s1001_s7 = smov (!%p165_p9), 40   ;;  %s1002_s8 = smov (!%p165_p9), 56  }
  0x13   : > { %v1085_v0 = vld [vmem:[%s1295_s1 + $0x30] sm:$0xff]  ;;  %v1090_v1 = vld [vmem:[%s1295_s1 + $0x20] sm:$0xff]  ;;  %s190_s9 = scalar_select %p189_p10, %s1055_s19, 1  ;;  %vm211_vm0 = vcmask 261120   ;;  %vm238_vm1 = vcmask 64512   ;;  %vm520_vm2 = vcmask 130048  }
  0x14   : > { %227 = vmatpush.msra.mxu2 %v1085_v0  ;;  %v887_v2 = vpack.i.bf16 %v1090_v1, %v1085_v0  ;;  %v1099_v3 = vld [vmem:[%s1295_s1 + $0x10] sm:$0xff]  ;;  %v1104_v4 = vld [vmem:[%s1295_s1] sm:$0xff]  ;;  %s1005_s11 = smov 16   ;;  %s1006_s12 = smov 8   ;;  %vm522_vm3 = vcmask 195584  }
  0x15   : > { %v892_v5 = vpack.i.bf16 %v1104_v4, %v1099_v3  ;;  %s811_s10 = sshll.u32 %s190_s9, 3  ;;  %v897_v7 = vld [vmem:[%s1297_s3] ss:$0 sm:$0xff]  ;;  %s1003_s9 = smov 48  }
  0x16   : > { %228 = vmatpush.msra.mxu2 %v1090_v1  ;;  %s192_s13 = scalar_lea.vmem %s1294_s0, %s811_s10  ;;  %s1004_s10 = smov 32  }
  0x17   : > { %v1114_v6 = vld [vmem:[%s192_s13] sm:$0xff]  ;;  %s1007_s13 = smov 24   ;;  %s829_s20 = sshll.u32 %s1055_s19, 3 }
  0x18   : > { %229 = vmatpush.msra.mxu2 %v1099_v3 }
  0x1a   : > { %230 = vmatpush.msra.mxu2 %v1104_v4 }
  0x1b   : > { %812 = vmatmul.msk.f32.vlgmr.msra.gmra.mxu2 %vm211_vm0, %v1114_v6 }
  0x9e   : > { %v232_v8 = vpop.f32.mrf.mxu2 }
  0x9f   : > { %v1122_v9 = vadd.f32 %v897_v7, %v232_v8 }
  0xa1   : > { %371 = vrot.lane.b32.xlu2 %v1122_v9, %s993_s22  ;;  %303 = vrot.lane.b32.xlu1 %v1122_v9, %s994_s23 }
  0xa2   : > { %236 = vrot.lane.b32.xlu0 %v1122_v9, %s995_s27 }
  0xa9   : > { %441 = vrot.lane.b32.xlu2 %v1122_v9, %s996_s28  ;;  %373 = vrot.lane.b32.xlu1 %v1122_v9, %s997_s29  ;;  %s742_s29 = scalar_lea.hbm %s1298_s4, %s829_s20 }
  0xaa   : > { %305 = vrot.lane.b32.xlu0 %v1122_v9, %s998_s30 }
  0xb2   : > { %439 = vrot.lane.b32.xlu0 %v1122_v9, %s999_s5 }
  0xfb   : > { %v372_v10 = vpop.permute.xlu2 %371 }
 0x103   : > { %v442_v14 = vpop.permute.xlu2 %441 }
 0x113   : > { %v304_v11 = vpop.permute.xlu1 %303 }
 0x114   : > { %v237_v12 = vpop.permute.xlu0 %236 }
 0x115   : > { %813 = vmatpush.xpose.msk.msra.mxu1 %vm238_vm1, %v237_v12 }
 0x118   : > { %814 = vmatmul.msk.f32.vlgmr.msra.gmra.mxu1 %vm238_vm1, %v1122_v9 }
 0x11b   : > { %v374_v13 = vpop.permute.xlu1 %373 }
 0x11c   : > { %v306_v15 = vpop.permute.xlu0 %305  ;;  %819 = vmatpush.xpose.msk.msrb.mxu1 %vm238_vm1, %v374_v13 }
 0x11d   : > { %816 = vmatpush.xpose.msk.msra.mxu3 %vm238_vm1, %v306_v15 }
 0x120   : > { %822 = vmatpush.xpose.msk.msra.mxu1 %vm238_vm1, %v442_v14  ;;  %817 = vmatmul.msk.f32.vlgmr.msra.gmra.mxu3 %vm238_vm1, %v304_v11 }
 0x121   : > { %820 = vmatmul.msk.f32.vlgmr.msrb.gmra.mxu1 %vm238_vm1, %v372_v10 }
 0x124   : > { %v440_v16 = vpop.permute.xlu0 %439 }
 0x129   : > { %823 = vmatmul.msk.f32.vlgmr.msra.gmra.mxu1 %vm238_vm1, %v440_v16 }
 0x195   : > { %v260_v17 = vpop.f32.mrf.mxu1 }
 0x196   : > { %v263_v18 = vsel %vm238_vm1, %v260_v17, -inf }
 0x197   : > { %264 = vmax.xlane.f32.xlu1 %v263_v18 }
 0x19e   : > { %v396_v19 = vpop.f32.mrf.mxu1 }
 0x19f   : > { %v399_v20 = vsel %vm238_vm1, %v396_v19, -inf }
 0x1a0   : > { %400 = vmax.xlane.f32.xlu0 %v399_v20 }
 0x1a3   : > { %v328_v21 = vpop.f32.mrf.mxu3 }
 0x1a4   : > { %v331_v22 = vsel %vm238_vm1, %v328_v21, -inf }
 0x1a5   : > { %332 = vmax.xlane.f32.xlu2 %v331_v22 }
 0x1a6   : > { %v464_v23 = vpop.f32.mrf.mxu1 }
 0x1a7   : > { %v467_v24 = vsel %vm238_vm1, %v464_v23, -inf }
 0x1ad   : > { %468 = vmax.xlane.f32.xlu2 %v467_v24 }
 0x1b4   : > { %277 = vrot.lane.b32.xlu0 %v1122_v9, %s1000_s6 }
 0x1bc   : > { %481 = vrot.lane.b32.xlu0 %v1122_v9, %s1001_s7  ;;  %s746_s7 = sshll.u32 %s742_s29, 4  ;;  %s747_s7 = int_to_ptr.hbm [resolvable:$true] %s746_s7 }
 0x1c4   : > { %888 = vrot.lane.b32.xlu0 %v887_v2, %s1004_s10 }
 0x1cc   : > { %893 = vrot.lane.b32.xlu0 %v892_v5, %s1004_s10 }
 0x20a   : > { %v265_v25 = vpop.xlane.xlu1 %264 }
 0x20b   : > { %v266_v26 = vsub.f32 %v260_v17, %v265_v25 }
 0x20d   : > { %v267_v27 = vmul.f32 1.442695, %v266_v26  ;;  %v898_v26 = vld [vmem:[%s1297_s3 + $0x1] ss:$0 sm:$0xff] }
 0x20f   : > { %905 = vpow2.f32 %v267_v27 }
 0x213   : > { %v401_v28 = vpop.xlane.xlu0 %400 }
 0x214   : > { %v402_v29 = vsub.f32 %v396_v19, %v401_v28 }
 0x215   : > { %v906_v30 = vpop.eup %905 }
 0x216   : > { %v403_v31 = vmul.f32 1.442695, %v402_v29  ;;  %v269_v32 = vsel %vm238_vm1, %v906_v30, 0.0 }
 0x217   : > { %270 = vadd.xlane.f32.xlu1 %v269_v32 }
 0x218   : > { %907 = vpow2.f32 %v403_v31  ;;  %v333_v33 = vpop.xlane.xlu2 %332  ;;  %v1008_v31 = vmov 32.0  }
 0x219   : > { %v334_v34 = vsub.f32 %v328_v21, %v333_v33 }
 0x21b   : > { %v335_v35 = vmul.f32 1.442695, %v334_v34 }
 0x21d   : > { %909 = vpow2.f32 %v335_v35 }
 0x21e   : > { %v908_v36 = vpop.eup %907 }
 0x21f   : > { %v405_v37 = vsel %vm238_vm1, %v908_v36, 0.0 }
 0x220   : > { %406 = vadd.xlane.f32.xlu1 %v405_v37  ;;  %v469_v38 = vpop.xlane.xlu2 %468 }
 0x221   : > { %v470_v39 = vsub.f32 %v464_v23, %v469_v38 }
 0x223   : > { %v910_v40 = vpop.eup %909  ;;  %v471_v41 = vmul.f32 1.442695, %v470_v39 }
 0x224   : > { %v337_v42 = vsel %vm238_vm1, %v910_v40, 0.0 }
 0x225   : > { %911 = vpow2.f32 %v471_v41  ;;  %338 = vadd.xlane.f32.xlu2 %v337_v42  ;;  %v201_v42 = vld [vmem:[%s1295_s1 + $0x38] sm:$0xff] }
 0x226   : > { %v278_v43 = vpop.permute.xlu0 %277 }
 0x227   : > { %298 = vmatpush.msrb.mxu2 %v278_v43  ;;  %v200_v43 = vld [vmem:[%s1295_s1 + $0x28] sm:$0xff] }
 0x22b   : > { %v912_v44 = vpop.eup %911 }
 0x22c   : > { %v473_v45 = vsel %vm238_vm1, %v912_v44, 0.0 }
 0x22d   : > { %474 = vadd.xlane.f32.xlu2 %v473_v45  ;;  %v198_v45 = vld [vmem:[%s1295_s1 + $0x8] sm:$0xff] }
 0x22e   : > { %v482_v2 = vpop.permute.xlu0 %481 }
 0x236   : > { %v889_v14 = vpop.permute.xlu0 %888 }
 0x237   : > { %v891_v15 = vunpack.i.h.bf16 %v889_v14  ;;  %v890_v16 = vunpack.i.l.bf16 %v889_v14 }
 0x239   : > { %345 = vrot.lane.b32.xlu1 %v1122_v9, %s1002_s8  ;;  %556 = vmatpush.msrb.mxu1 %v890_v16 }
 0x23b   : > { %557 = vmatpush.msrb.mxu1 %v891_v15  ;;  %v671_v15 = vld [vmem:[%s1296_s2 + $0x28] sm:$0xff] }
 0x23e   : > { %v894_v17 = vpop.permute.xlu0 %893 }
 0x23f   : > { %v896_v18 = vunpack.i.h.bf16 %v894_v17  ;;  %v895_v19 = vunpack.i.l.bf16 %v894_v17 }
 0x241   : > { %558 = vmatpush.msrb.mxu1 %v895_v19 }
 0x243   : > { %559 = vmatpush.msrb.mxu1 %v896_v18  ;;  %v670_v18 = vld [vmem:[%s1296_s2 + $0x20] sm:$0xff] }
 0x245   : > { %413 = vrot.lane.b32.xlu2 %v1122_v9, %s1003_s9  ;;  %s943_s9 = sshra.s32 %s747_s7, 4  ;;  %s944_s9 = int_to_ptr.hbm [resolvable:$true] %s943_s9 }
 0x246   : > { %s945_s10 = scalar_lea.hbm %s944_s9, 8  ;;  %p950_p0 = scmp.lt.s32.totalorder %s944_s9, %s1298_s4 }
 0x247   : > { %p946_p11 = scmp.ne.s32.totalorder %s944_s9, %s945_s10 }
 0x249   : > { %p947_p12 = pnand %p946_p11, %p1072_p5 }
 0x24b   : > { %p948_p13 = pneg %p947_p12 }
 0x28a   : > { %v271_v46 = vpop.xlane.xlu1 %270 }
 0x28b   : > { %913 = vrcp.f32 %v271_v46 }
 0x291   : > { %v914_v47 = vpop.eup %913 }
 0x292   : > { %v273_v48 = vmul.f32 %v914_v47, %v271_v46 }
 0x293   : > { %v407_v49 = vpop.xlane.xlu1 %406 }
 0x294   : > { %915 = vrcp.f32 %v407_v49  ;;  %v274_v50 = vsub.f32 2.0, %v273_v48 }
 0x296   : > { %v275_v51 = vmul.f32 %v914_v47, %v274_v50 }
 0x298   : > { %v276_v52 = vmul.f32 %v906_v30, %v275_v51  ;;  %v339_v53 = vpop.xlane.xlu2 %338 }
 0x299   : > { %917 = vrcp.f32 %v339_v53 }
 0x29a   : > { %v916_v54 = vpop.eup %915  ;;  %815 = vmatmul.msk.f32.vlgmr.msrb.gmra.mxu2 %vm238_vm1, %v276_v52 }
 0x29b   : > { %v409_v55 = vmul.f32 %v916_v54, %v407_v49 }
 0x29d   : > { %v410_v57 = vsub.f32 2.0, %v409_v55  ;;  %v899_v55 = vld [vmem:[%s1297_s3 + $0x4] ss:$0 sm:$0xff] }
 0x29f   : > { %v918_v56 = vpop.eup %917  ;;  %v411_v61 = vmul.f32 %v916_v54, %v410_v57 }
 0x2a0   : > { %v341_v58 = vmul.f32 %v918_v56, %v339_v53  ;;  %v475_v59 = vpop.xlane.xlu2 %474 }
 0x2a1   : > { %919 = vrcp.f32 %v475_v59  ;;  %v412_v7 = vmul.f32 %v908_v36, %v411_v61  ;;  %v681_v61 = vld [vmem:[%s1296_s2 + $0x78] sm:$0xff] }
 0x2a2   : > { %v342_v60 = vsub.f32 2.0, %v341_v58  ;;  %921 = vrcp.f32 %v1008_v31  ;;  %v900_v58 = vld [vmem:[%s1297_s3 + $0x5] ss:$0 sm:$0xff]  ;;  %683 = vmatpush.msra.mxu0 %v681_v61 }
 0x2a4   : > { %v343_v62 = vmul.f32 %v918_v56, %v342_v60 }
 0x2a6   : > { %v344_v10 = vmul.f32 %v910_v40, %v343_v62  ;;  %v680_v62 = vld [vmem:[%s1296_s2 + $0x70] sm:$0xff] }
 0x2a7   : > { %v920_v63 = vpop.eup %919  ;;  %684 = vmatpush.msra.mxu0 %v680_v62 }
 0x2a8   : > { %v477_v8 = vmul.f32 %v920_v63, %v475_v59  ;;  %v414_v9 = vpop.permute.xlu2 %413  ;;  %v922_v32 = vpop.eup %921 }
 0x2a9   : > { %434 = vmatpush.msrb.mxu3 %v414_v9  ;;  %v569_v33 = vmul.f32 32.0, %v922_v32  ;;  %vm573_vm4 = vweird.f32 %v922_v32  ;;  %v677_v9 = vld [vmem:[%s1296_s2 + $0x58] sm:$0xff] }
 0x2aa   : > { %v478_v0 = vsub.f32 2.0, %v477_v8  ;;  %821 = vmatmul.msk.f32.vlgmr.msrb.gmra.mxu3 %vm238_vm1, %v412_v7  ;;  %v901_v7 = vld [vmem:[%s1297_s3 + $0x2] ss:$0 sm:$0xff] }
 0x2ab   : > { %v346_v1 = vpop.permute.xlu1 %345  ;;  %v570_v34 = vsub.f32 1.0, %v569_v33  ;;  %614 = vmatpush.msra.mxu3 %v201_v42  ;;  %v678_v8 = vld [vmem:[%s1296_s2 + $0x60] sm:$0xff] }
 0x2ac   : > { %366 = vmatpush.msra.mxu2 %v346_v1  ;;  %v479_v11 = vmul.f32 %v920_v63, %v478_v0  ;;  %v679_v63 = vld [vmem:[%s1296_s2 + $0x68] sm:$0xff] }
 0x2ad   : > { %818 = vmatmul.msk.f32.vlgmr.msra.gmra.mxu2 %vm238_vm1, %v344_v10  ;;  %v571_v35 = vmul.f32 %v922_v32, %v570_v34  ;;  %615 = vmatpush.msra.mxu3 %v200_v43  ;;  %v676_v10 = vld [vmem:[%s1296_s2 + $0x50] sm:$0xff] }
 0x2ae   : > { %502 = vmatpush.msrb.mxu2 %v482_v2  ;;  %v480_v12 = vmul.f32 %v912_v44, %v479_v11  ;;  %v199_v44 = vld [vmem:[%s1295_s1 + $0x18] sm:$0xff]  ;;  %685 = vmatpush.msra.mxu0 %v679_v63  ;;  %v675_v2 = vld [vmem:[%s1296_s2 + $0x48] sm:$0xff] }
 0x2af   : > { %v572_v36 = vadd.f32 %v922_v32, %v571_v35  ;;  %616 = vmatpush.msra.mxu3 %v199_v44 }
 0x2b0   : > { %686 = vmatpush.msra.mxu0 %v678_v8 }
 0x2b1   : > { %v1169_v37 = vsel %vm573_vm4, %v922_v32, %v572_v36  ;;  %617 = vmatpush.msra.mxu3 %v198_v45 }
 0x2b2   : > { %687 = vmatpush.msra.mxu0 %v677_v9 }
 0x2b4   : > { %688 = vmatpush.msra.mxu0 %v676_v10 }
 0x2b5   : > { %824 = vmatmul.msk.f32.vlgmr.msrb.gmra.mxu2 %vm238_vm1, %v480_v12  ;;  %v674_v12 = vld [vmem:[%s1296_s2 + $0x40] sm:$0xff] }
 0x2b6   : > { %689 = vmatpush.msra.mxu0 %v675_v2 }
 0x2b8   : > { %690 = vmatpush.msra.mxu0 %v674_v12 }
 0x31d   : > { %v300_v3 = vpop.f32.mrf.mxu2 }
 0x32d   : > { %v436_v4 = vpop.f32.mrf.mxu3 }
 0x32e   : > { %512 = vrot.lane.b32.xlu2 %v436_v4, %s1005_s11  ;;  %v673_v4 = vld [vmem:[%s1296_s2 + $0x38] sm:$0xff] }
 0x32f   : > { %691 = vmatpush.msra.mxu0 %v673_v4 }
 0x330   : > { %v368_v5 = vpop.f32.mrf.mxu2 }
 0x331   : > { %508 = vrot.lane.b32.xlu1 %v368_v5, %s1006_s12 }
 0x338   : > { %v504_v13 = vpop.f32.mrf.mxu2 }
 0x339   : > { %516 = vrot.lane.b32.xlu1 %v504_v13, %s1007_s13  ;;  %v672_v13 = vld [vmem:[%s1296_s2 + $0x30] sm:$0xff]  ;;  %s186_s13 = sand.u32 1, %s983_s16  }
 0x33a   : > { %692 = vmatpush.msra.mxu0 %v672_v13  ;;  %s810_s14 = sshll.u32 %s186_s13, 3  ;;  %s732_s8 = scalar_lea.sflag [#allocation3], %s186_s13 }
 0x33b   : > { %s188_s6 = scalar_lea.vmem [#allocation2], %s810_s14  ;;  %s949_s14 = scalar_lea.hbm %s1298_s4, 16 }
 0x33c   : > { %693 = vmatpush.msra.mxu0 %v671_v15  ;;  %s744_s19 = sshll.u32 %s188_s6, 4  ;;  %p951_p1 = scmp.lt.s32.totalorder %s949_s14, %s945_s10  ;;  %s745_s19 = int_to_ptr.vmem [resolvable:$true] %s744_s19 }
 0x33e   : > { %694 = vmatpush.msra.mxu0 %v670_v18  ;;  %p952_p2 = por %p951_p1, %p950_p0 }
 0x340   : > { %p953_p3 = pnand %p952_p2, %p948_p13 }
 0x388   : > { %v513_v22 = vpop.permute.xlu2 %512 }
 0x3a3   : > { %v509_v20 = vpop.permute.xlu1 %508 }
 0x3a4   : > { %v519_v21 = vsel %vm238_vm1, %v300_v3, %v509_v20 }
 0x3a5   : > { %v521_v23 = vsel %vm520_vm2, %v519_v21, %v513_v22  ;;  %v669_v21 = vld [vmem:[%s1296_s2 + $0x18] sm:$0xff] }
 0x3a6   : > { %695 = vmatpush.msra.mxu0 %v669_v21 }
 0x3ab   : > { %v517_v24 = vpop.permute.xlu1 %516 }
 0x3ac   : > { %v523_v25 = vsel %vm522_vm3, %v521_v23, %v517_v24  ;;  %v668_v23 = vld [vmem:[%s1296_s2 + $0x10] sm:$0xff] }
 0x3ad   : > { %825 = vmatmul.msk.f32.vlgmr.msrb.gmra.mxu1 %vm211_vm0, %v523_v25  ;;  %696 = vmatpush.msra.mxu0 %v668_v23 }
 0x42a   : > { %v561_v27 = vpop.f32.mrf.mxu1 }
 0x42b   : > { %v562_v28 = vadd.f32 %v898_v26, %v561_v27  ;;  %v667_v26 = vld [vmem:[%s1296_s2 + $0x8] sm:$0xff] }
 0x42c   : > { %697 = vmatpush.msra.mxu0 %v667_v26 }
 0x42d   : > { %v564_v29 = vadd.f32 %v562_v28, %v1114_v6  ;;  %v666_v28 = vld [vmem:[%s1296_s2] sm:$0xff] }
 0x42e   : > { %698 = vmatpush.msra.mxu0 %v666_v28 }
 0x42f   : > { %v565_v30 = vsel %vm211_vm0, %v564_v29, 0.0 }
 0x430   : > { %566 = vadd.xlane.f32.xlu0 %v565_v30 }
 0x4a3   : > { %v567_v38 = vpop.xlane.xlu0 %566 }
 0x4a4   : > { %v575_v39 = vmul.f32 %v1169_v37, %v567_v38 }
 0x4a6   : > { %v576_v40 = vsub.f32 %v564_v29, %v575_v39 }
 0x4a8   : > { %v577_v41 = vmul.f32 %v576_v40, %v576_v40 }
 0x4aa   : > { %v578_v6 = vsel %vm211_vm0, %v577_v41, 0.0 }
 0x4ab   : > { %579 = vadd.xlane.f32.xlu2 %v578_v6 }
 0x51e   : > { %v580_v46 = vpop.xlane.xlu2 %579 }
 0x51f   : > { %v581_v47 = vmul.f32 %v580_v46, %v1169_v37 }
 0x521   : > { %v582_v48 = vadd.f32 1e-05, %v581_v47 }
 0x523   : > { %923 = vrsqrt.f32 %v582_v48  ;;  %vm589_vm6 = vweird.f32 %v582_v48 }
 0x529   : > { %v924_v49 = vpop.eup %923 }
 0x52a   : > { %v584_v50 = vmul.f32 %v924_v49, %v582_v48  ;;  %vm590_vm5 = vweird.f32 %v924_v49 }
 0x52b   : > { %vm591_vm7 = vmor %vm589_vm6, %vm590_vm5 }
 0x52c   : > { %v585_v51 = vmul.f32 %v924_v49, %v584_v50 }
 0x52e   : > { %v586_v52 = vmul.f32 0.5, %v585_v51 }
 0x530   : > { %v587_v53 = vsub.f32 1.5, %v586_v52 }
 0x532   : > { %v588_v54 = vmul.f32 %v924_v49, %v587_v53 }
 0x534   : > { %v592_v56 = vsel %vm591_vm7, %v924_v49, %v588_v54 }
 0x535   : > { %v593_v57 = vmul.f32 %v592_v56, %v576_v40  ;;  %v902_v56 = vld [vmem:[%s1297_s3 + $0x3] ss:$0 sm:$0xff] }
 0x537   : > { %v595_v59 = vmul.f32 %v899_v55, %v593_v57 }
 0x539   : > { %v1192_v60 = vadd.f32 %v900_v58, %v595_v59 }
 0x53b   : > { %826 = vmatmul.msk.f32.vlgmr.msra.gmra.mxu3 %vm211_vm0, %v1192_v60 }
 0x5be   : > { %v619_v0 = vpop.f32.mrf.mxu3 }
 0x5bf   : > { %v620_v1 = vadd.f32 %v901_v7, %v619_v0 }
 0x5c1   : > { %v623_v11 = vmul.f32 0.70710677, %v620_v1  ;;  %v622_v53 = vmul.f32 0.5, %v620_v1 }
 0x5c3   : > { %v624_v3 = vmul.f32 %v623_v11, %v623_v11 }
 0x5c5   : > { %v625_v5 = vmin.f32 %v624_v3, 16.0 }
 0x5c7   : > { %v626_v14 = vmul.f32 2.1237322e-06, %v625_v5  ;;  %v637_v16 = vmul.f32 3.8918573e-05, %v625_v5 }
 0x5c9   : > { %v627_v17 = vadd.f32 0.00028619796, %v626_v14  ;;  %v638_v19 = vadd.f32 0.001143296, %v637_v16  ;;  %v904_v14 = vld [vmem:[%s1297_s3 + $0x7] ss:$0 sm:$0xff] }
 0x5cb   : > { %v628_v20 = vmul.f32 %v627_v17, %v625_v5  ;;  %v639_v22 = vmul.f32 %v638_v19, %v625_v5 }
 0x5cd   : > { %v640_v24 = vadd.f32 0.014752088, %v639_v22  ;;  %v629_v25 = vadd.f32 0.0036580483, %v628_v20 }
 0x5cf   : > { %v641_v27 = vmul.f32 %v640_v24, %v625_v5  ;;  %v630_v30 = vmul.f32 %v629_v25, %v625_v5 }
 0x5d1   : > { %v642_v29 = vadd.f32 0.112945676, %v641_v27  ;;  %v631_v33 = vadd.f32 0.05243302, %v630_v30 }
 0x5d3   : > { %v643_v31 = vmul.f32 %v642_v29, %v625_v5  ;;  %v632_v36 = vmul.f32 %v631_v33, %v625_v5 }
 0x5d5   : > { %v644_v32 = vadd.f32 0.4994258, %v643_v31  ;;  %v633_v38 = vadd.f32 0.18741608, %v632_v36 }
 0x5d7   : > { %v645_v34 = vmul.f32 %v644_v32, %v625_v5  ;;  %v634_v40 = vmul.f32 %v633_v38, %v625_v5  ;;  %v903_v5 = vld [vmem:[%s1297_s3 + $0x6] ss:$0 sm:$0xff] }
 0x5d9   : > { %v646_v35 = vadd.f32 1.0, %v645_v34  ;;  %v635_v43 = vadd.f32 1.1283791, %v634_v40 }
 0x5db   : > { %925 = vrcp.f32 %v646_v35  ;;  %v658_v42 = vand.u32 2147483648, %v646_v35  ;;  %v656_v45 = vand.u32 2147483647, %v646_v35  ;;  %vm652_vm9 = vweird.f32 %v646_v35 }
 0x5dc   : > { %v636_v48 = vmul.f32 %v635_v43, %v623_v11 }
 0x5dd   : > { %v659_v47 = vor.u32 1.1754944e-38, %v658_v42  ;;  %vm657_vm11 = vcmp.eq.f32.partialorder %v656_v45, 8.507059e+37 }
 0x5e1   : > { %v926_v39 = vpop.eup %925 }
 0x5e2   : > { %v648_v41 = vmul.f32 %v926_v39, %v646_v35  ;;  %vm653_vm8 = vweird.f32 %v926_v39 }
 0x5e3   : > { %vm654_vm10 = vmor %vm652_vm9, %vm653_vm8 }
 0x5e4   : > { %v649_v6 = vsub.f32 1.0, %v648_v41 }
 0x5e6   : > { %v650_v44 = vmul.f32 %v926_v39, %v649_v6 }
 0x5e8   : > { %v651_v46 = vadd.f32 %v926_v39, %v650_v44 }
 0x5ea   : > { %v655_v49 = vsel %vm654_vm10, %v926_v39, %v651_v46 }
 0x5eb   : > { %v660_v50 = vsel %vm657_vm11, %v659_v47, %v655_v49 }
 0x5ec   : > { %v661_v51 = vmul.f32 %v660_v50, %v636_v48 }
 0x5ee   : > { %v827_v52 = vclamps-f32 %v661_v51, 1.0 }
 0x5f0   : > { %v664_v54 = vadd.f32 1.0, %v827_v52 }
 0x5f2   : > { %v665_v55 = vmul.f32 %v664_v54, %v622_v53 }
 0x5f4   : > { %699 = vmatmul.f32.vlgmr.msra.gmra.mxu0 %v665_v55 }
 0x671   : > { %v700_v57 = vpop.f32.mrf.mxu0 }
 0x672   : > { %v701_v58 = vadd.f32 %v902_v56, %v700_v57 }
 0x674   : > { %v703_v59 = vadd.f32 %v701_v58, %v1192_v60 }
 0x676   : > { %v704_v61 = vsel %vm211_vm0, %v703_v59, 0.0 }
 0x677   : > { %705 = vadd.xlane.f32.xlu1 %v704_v61 }
 0x6ea   : > { %v706_v62 = vpop.xlane.xlu1 %705 }
 0x6eb   : > { %v707_v63 = vmul.f32 %v706_v62, %v1169_v37 }
 0x6ed   : > { %v708_v7 = vsub.f32 %v703_v59, %v707_v63 }
 0x6ef   : > { %v709_v8 = vmul.f32 %v708_v7, %v708_v7 }
 0x6f1   : > { %v710_v9 = vsel %vm211_vm0, %v709_v8, 0.0 }
 0x6f2   : > { %711 = vadd.xlane.f32.xlu0 %v710_v9 }
 0x765   : > { %v712_v10 = vpop.xlane.xlu0 %711 }
 0x766   : > { %v713_v0 = vmul.f32 %v712_v10, %v1169_v37 }
 0x768   : > { %v714_v1 = vadd.f32 1e-05, %v713_v0 }
 0x76a   : > { %927 = vrsqrt.f32 %v714_v1  ;;  %vm721_vm13 = vweird.f32 %v714_v1 }
 0x770   : > { %v928_v2 = vpop.eup %927 }
 0x771   : > { %v716_v60 = vmul.f32 %v928_v2, %v714_v1  ;;  %vm722_vm12 = vweird.f32 %v928_v2 }
 0x772   : > { %vm723_vm14 = vmor %vm721_vm13, %vm722_vm12 }
 0x773   : > { %v717_v11 = vmul.f32 %v928_v2, %v716_v60 }
 0x775   : > { %v718_v12 = vmul.f32 0.5, %v717_v11 }
 0x777   : > { %v719_v3 = vsub.f32 1.5, %v718_v12 }
 0x779   : > { %v720_v4 = vmul.f32 %v928_v2, %v719_v3 }
 0x77b   : > { %v724_v37 = vsel %vm723_vm14, %v928_v2, %v720_v4 }
 0x77c   : > { %v725_v13 = vmul.f32 %v724_v37, %v708_v7 }
 0x77e   : > { %v727_v15 = vmul.f32 %v903_v5, %v725_v13 }
 0x780   : > { %v729_v16 = vadd.f32 %v904_v14, %v727_v15 }
 0x782   : > { %730 = vst.msk [vmem:[%s188_s6] sm:$0xff] %vm211_vm0, %v729_v16 }
 0x783   : > { %956 = shalt.err (!%p953_p3)
}
 0x784   : > { %832 = dma.vmem_to_hbm [thread:$0]  (%p1072_p5), %s745_s19, 128, %s747_s7, %s732_s8  }
 0x785 PF: > { %p838_p4 = scmp.ge.s32.totalorder %s991_s18, 2  ;;  %s758_s13 = sand.u32 1, %s979_s15  }
 0x786   : > { %s759_s23 = scalar_lea.sflag [#allocation3], %s758_s13 }
 0x787   : > { %p835_p7 = pnand %p838_p4, %p1076_p6 }
 0x789   : > { %p836_p8 = pneg %p835_p7 }
 0x78b   : > { %974 = dma.done.wait (%p836_p8), %s759_s23, 128  }
 0x78c   : > { %976 = vsyncadd (%p836_p8), %s759_s23, 4294967168  ;;  %p14_p9 = scmp.ge.s32.totalorder %s1059_s21, 4   ;;  %s1301_s15 = smov %s983_s16 }
 0x78d   : > { %s1302_s16 = smov %s987_s17  ;;  %s1303_s17 = smov %s1070_s24 }
 0x78e   : > { %s1304_s18 = smov %s1059_s21  ;;  %16 = sbr.rel (!%p14_p9) target bundleno = 3 (0x3), region = 71 }
 0x793   :  { %765 = vsyncpa [#allocation3], 1 }
 0x794   :  { %767 = vsyncpa [#allocation3 + $0x1], 1 }

</bundles_post_ra>
